<compile_context>
chip_gen: v7x
topology: tpu7x:2x2x1
jax: 0.10.0
libtpu: 0.0.40
codegen_flags: <defaults>
</compile_context>

<pallas_src>
import functools

import jax
import jax.numpy as jnp
from jax.experimental import pallas as pl
from jax.experimental.pallas import tpu as pltpu


def lstm_fusion_kernel(
    H_ref, att_feat_ref, pre_h_ref, pre_c_ref,
    w_h2att_ref, b_att_ref,        # b_att = b_h2att + b_ctx2att (pre-summed)
    w_ctx2att_ref, w_alpha_ref,    # w_alpha passed as a (1, Ah) row
    w_fused_ref, b_fused_ref,      # [w_H2h ; w_z2h], b_H2h + b_z2h
    hc_ref,
    *, rnn_size):
    R = rnn_size

    H = H_ref[...]                        # (B, H_size)  f32
    att_feat = att_feat_ref[...]          # (B, A, F)    f32
    pre_h = pre_h_ref[...]                # (B, R)       f32
    pre_c = pre_c_ref[...]                # (B, R)       f32

    B, A, F = att_feat.shape
    Ah = w_h2att_ref.shape[1]

    # ------------------ AttentionModelCore ------------------
    # att_h = h2att(pre_h) + combined attention bias : (B, Ah)
    att_h = jnp.dot(pre_h.astype(jnp.bfloat16), w_h2att_ref[...],
                    preferred_element_type=jnp.float32) + b_att_ref[...]
    # p_att = ctx2att(att_feat) : (B, A, Ah)  (bias folded into att_h above)
    p_att = jnp.dot(att_feat.reshape(B * A, F).astype(jnp.bfloat16),
                    w_ctx2att_ref[...],
                    preferred_element_type=jnp.float32).reshape(B, A, Ah)
    dot = jnp.tanh(p_att + att_h[:, None, :])          # (B, A, Ah)

    # alpha_net as VPU multiply + lane reduce (b_alpha is a no-op under softmax)
    e = jnp.sum(dot * w_alpha_ref[...], axis=-1)        # (B, A)

    # softmax over attention slots
    m = jnp.max(e, axis=-1, keepdims=True)
    p = jnp.exp(e - m)
    inv_den = pl.reciprocal(jnp.sum(p, axis=-1, keepdims=True), approx=True)
    w_att = p * inv_den                                 # (B, A)

    # z = weighted sum of attention features : (B, F)
    z = jnp.sum(w_att[:, :, None] * att_feat, axis=1)

    # ------------------ fused LSTM body ------------------
    # [H || z] @ [w_H2h ; w_z2h] + (b_H2h + b_z2h)  : (B, 4R)
    xz = jnp.concatenate([H, z], axis=-1).astype(jnp.bfloat16)
    s = jnp.dot(xz, w_fused_ref[...],
                preferred_element_type=jnp.float32) + b_fused_ref[...]

    sig = jax.nn.sigmoid(s[:, : 3 * R])
    in_gate = sig[:, 0:R]
    forget_gate = sig[:, R:2 * R]
    out_gate = sig[:, 2 * R:3 * R]
    in_transform = jnp.tanh(s[:, 3 * R:4 * R])

    next_c = forget_gate * pre_c + in_gate * in_transform
    next_h = out_gate * jnp.tanh(next_c)
    # TODO(synk): nn.Dropout(drop_prob_fusion) is identity in eval mode; no RNG applied here.

    # single lane-dense packed store: [next_h || next_c]
    hc_ref[...] = jnp.concatenate([next_h, next_c], axis=-1).astype(hc_ref.dtype)


def lstm_fusion_no_input_core(H, att_feat, state, params, rnn_size):
    """JAX wrapper mirroring LSTMFusionNoInputCore.forward (maxout=0, eval mode)."""
    pre_h = state[0][-1]
    pre_c = state[1][-1]
    B, H_size = H.shape
    _, A, F = att_feat.shape
    Ah = params["w_h2att"].shape[1]
    R = rnn_size

    # ---- kernel-friendly parameter prep (done once per call, pure XLA) ----
    w_h2att = params["w_h2att"].astype(jnp.bfloat16)                 # (R, Ah)
    w_ctx2att = params["w_ctx2att"].astype(jnp.bfloat16)             # (F, Ah)
    b_att = (params["b_h2att"] + params["b_ctx2att"]).astype(jnp.float32)  # (1, Ah)
    w_alpha_row = params["w_alpha"].T.astype(jnp.float32)            # (1, Ah)
    w_fused = jnp.concatenate([params["w_H2h"], params["w_z2h"]],
                              axis=0).astype(jnp.bfloat16)           # (H_size+F, 4R)
    b_fused = (params["b_H2h"] + params["b_z2h"]).astype(jnp.float32)  # (1, 4R)

    # ---- pad batch to a multiple of 8 (f32 sublane) for unmasked stores ----
    B_pad = ((B + 7) // 8) * 8
    pad = B_pad - B
    if pad:
        H_p = jnp.pad(H, ((0, pad), (0, 0)))
        att_p = jnp.pad(att_feat, ((0, pad), (0, 0), (0, 0)))
        h_p = jnp.pad(pre_h, ((0, pad), (0, 0)))
        c_p = jnp.pad(pre_c, ((0, pad), (0, 0)))
    else:
        H_p, att_p, h_p, c_p = H, att_feat, pre_h, pre_c

    # ---- cost estimate hint for XLA scheduling ----
    flops = 2 * B_pad * (R * Ah + A * F * Ah + A * Ah + A * F
                         + (H_size + F) * 4 * R)
    transcendentals = B_pad * (A * Ah + A + 5 * R)
    bytes_accessed = (
        (H_p.size + att_p.size + h_p.size + c_p.size) * 4
        + (w_h2att.size + w_ctx2att.size + w_fused.size) * 2
        + (b_att.size + w_alpha_row.size + b_fused.size) * 4
        + B_pad * 2 * R * 4
    )
    cost = pl.CostEstimate(flops=flops, transcendentals=transcendentals,
                           bytes_accessed=bytes_accessed)

    inputs = (H_p, att_p, h_p, c_p,
              w_h2att, b_att, w_ctx2att, w_alpha_row, w_fused, b_fused)

    vmem = pl.BlockSpec(memory_space=pltpu.MemorySpace.VMEM)
    # TODO(synk): if this cell is driven by a timestep recurrence, move the time
    # loop inside the kernel (grid axis + resident weight BlockSpecs) so weights
    # stay VMEM-resident across steps; the module's forward is a single step.
    hc = pl.pallas_call(
        functools.partial(lstm_fusion_kernel, rnn_size=rnn_size),
        out_shape=jax.ShapeDtypeStruct((B_pad, 2 * R), jnp.float32),
        in_specs=[vmem] * len(inputs),
        out_specs=vmem,
        cost_estimate=cost,
    )(*inputs)

    next_h = hc[:B, :R]
    next_c = hc[:B, R:]
    output = next_h
    new_state = (next_h[None, ...], next_c[None, ...])
    return output, new_state


def reference_forward(H, att_feat, state, params, rnn_size):
    """Pure-JAX f32 reference mirroring the PyTorch module (incl. b_alpha)."""
    pre_h = state[0][-1]
    pre_c = state[1][-1]
    att_h = pre_h @ params["w_h2att"] + params["b_h2att"]
    p_att = jnp.einsum("baf,fh->bah", att_feat, params["w_ctx2att"]) + params["b_ctx2att"]
    dot = jnp.tanh(p_att + att_h[:, None, :])
    e = jnp.einsum("bah,ho->bao", dot, params["w_alpha"])[..., 0] + params["b_alpha"]
    w = jax.nn.softmax(e, axis=-1)
    z = jnp.sum(w[:, :, None] * att_feat, axis=1)
    s = H @ params["w_H2h"] + params["b_H2h"] + z @ params["w_z2h"] + params["b_z2h"]
    R = rnn_size
    sig = jax.nn.sigmoid(s[:, : 3 * R])
    i, f, o = sig[:, :R], sig[:, R:2 * R], sig[:, 2 * R:3 * R]
    g = jnp.tanh(s[:, 3 * R:4 * R])
    next_c = f * pre_c + i * g
    next_h = o * jnp.tanh(next_c)
    return next_h, (next_h[None], next_c[None])


def init_params(key, H_size, rnn_size, att_feat_size, att_hid_size):
    """Deterministic synthetic parameters (kernel layout: (in, out))."""
    ks = jax.random.split(key, 10)
    u = lambda k, shape, s: jax.random.uniform(k, shape, jnp.float32, -s, s)
    return {
        # AttentionModelCore
        "w_h2att": u(ks[0], (rnn_size, att_hid_size), 0.1),
        "b_h2att": u(ks[1], (1, att_hid_size), 0.05),
        "w_ctx2att": u(ks[2], (att_feat_size, att_hid_size), 0.1),
        "b_ctx2att": u(ks[3], (1, att_hid_size), 0.05),
        "w_alpha": u(ks[4], (att_hid_size, 1), 0.1),
        "b_alpha": u(ks[5], (1, 1), 0.05),
        # fusion linears (uniform(-0.1, 0.1) as in module __init__)
        "w_H2h": u(ks[6], (H_size, 4 * rnn_size), 0.1),
        "b_H2h": u(ks[7], (1, 4 * rnn_size), 0.05),
        "w_z2h": u(ks[8], (att_feat_size, 4 * rnn_size), 0.1),
        "b_z2h": u(ks[9], (1, 4 * rnn_size), 0.05),
    }


if __name__ == "__main__":
    B = 4
    H_size = 32
    rnn_size = 32
    att_feat_size = 32
    att_num = 8
    att_hid_size = 32

    key = jax.random.PRNGKey(0)
    k_p, k_H, k_af, k_h, k_c = jax.random.split(key, 5)

    params = init_params(k_p, H_size, rnn_size, att_feat_size, att_hid_size)
    H = jax.random.normal(k_H, (B, H_size), jnp.float32)
    att_feat = jax.random.normal(k_af, (B, att_num, att_feat_size), jnp.float32)
    state = (
        jax.random.normal(k_h, (1, B, rnn_size), jnp.float32),
        jax.random.normal(k_c, (1, B, rnn_size), jnp.float32),
    )

    output, new_state = lstm_fusion_no_input_core(H, att_feat, state, params, rnn_size)
    jax.block_until_ready(output)
    jax.block_until_ready(new_state)

    ref_out, ref_state = reference_forward(H, att_feat, state, params, rnn_size)
    # Tolerance loosened vs f32 reference: kernel feeds bf16 operands to the MXU
    # (f32 accumulation) and uses the approximate EUP reciprocal in the softmax.
    assert jnp.allclose(output, ref_out, atol=2e-2, rtol=2e-2)
    assert jnp.allclose(new_state[0], ref_state[0], atol=2e-2, rtol=2e-2)
    assert jnp.allclose(new_state[1], ref_state[1], atol=2e-2, rtol=2e-2)

    print("KERNEL_OK")
</pallas_src>

<mosaic_0001>
module attributes {stable_mosaic.version = 11 : i64} {
  func.func @lstm_fusion_kernel(%arg0: memref<8x32xf32, #tpu.memory_space<vmem>>, %arg1: memref<8x8x32xf32, #tpu.memory_space<vmem>>, %arg2: memref<8x32xf32, #tpu.memory_space<vmem>>, %arg3: memref<8x32xf32, #tpu.memory_space<vmem>>, %arg4: memref<32x32xbf16, #tpu.memory_space<vmem>>, %arg5: memref<1x32xf32, #tpu.memory_space<vmem>>, %arg6: memref<32x32xbf16, #tpu.memory_space<vmem>>, %arg7: memref<1x32xf32, #tpu.memory_space<vmem>>, %arg8: memref<64x128xbf16, #tpu.memory_space<vmem>>, %arg9: memref<1x128xf32, #tpu.memory_space<vmem>>, %arg10: memref<8x64xf32, #tpu.memory_space<vmem>>) attributes {dimension_semantics = [], scalar_prefetch = 0 : i64, scratch_operands = 0 : i64, tpu.core_type = #tpu.core_type<tc>} {
    %c0 = arith.constant 0 : index
    %c0_0 = arith.constant 0 : index
    %0 = vector.load %arg0[%c0, %c0_0] : memref<8x32xf32, #tpu.memory_space<vmem>>, vector<8x32xf32>
    %c0_1 = arith.constant 0 : index
    %c0_2 = arith.constant 0 : index
    %c0_3 = arith.constant 0 : index
    %1 = vector.load %arg1[%c0_1, %c0_2, %c0_3] : memref<8x8x32xf32, #tpu.memory_space<vmem>>, vector<8x8x32xf32>
    %c0_4 = arith.constant 0 : index
    %c0_5 = arith.constant 0 : index
    %2 = vector.load %arg2[%c0_4, %c0_5] : memref<8x32xf32, #tpu.memory_space<vmem>>, vector<8x32xf32>
    %c0_6 = arith.constant 0 : index
    %c0_7 = arith.constant 0 : index
    %3 = vector.load %arg3[%c0_6, %c0_7] : memref<8x32xf32, #tpu.memory_space<vmem>>, vector<8x32xf32>
    %4 = arith.truncf %2 : vector<8x32xf32> to vector<8x32xbf16>
    %c0_8 = arith.constant 0 : index
    %c0_9 = arith.constant 0 : index
    %5 = vector.load %arg4[%c0_8, %c0_9] : memref<32x32xbf16, #tpu.memory_space<vmem>>, vector<32x32xbf16>
    %cst = arith.constant dense<0.000000e+00> : vector<8x32xf32>
    %6 = tpu.matmul %4, %5, %cst {dimension_numbers = #tpu.dot_dimension_numbers<[1], [0], [0], [1], [0, 0, 1, 1], [], []>} : vector<8x32xbf16>, vector<32x32xbf16>, vector<8x32xf32> -> vector<8x32xf32>
    %c0_10 = arith.constant 0 : index
    %c0_11 = arith.constant 0 : index
    %7 = vector.load %arg5[%c0_10, %c0_11] : memref<1x32xf32, #tpu.memory_space<vmem>>, vector<1x32xf32>
    %8 = vector.broadcast %7 : vector<1x32xf32> to vector<8x32xf32>
    %9 = arith.addf %6, %8 : vector<8x32xf32>
    %10 = vector.shape_cast %1 : vector<8x8x32xf32> to vector<64x32xf32>
    %11 = arith.truncf %10 : vector<64x32xf32> to vector<64x32xbf16>
    %c0_12 = arith.constant 0 : index
    %c0_13 = arith.constant 0 : index
    %12 = vector.load %arg6[%c0_12, %c0_13] : memref<32x32xbf16, #tpu.memory_space<vmem>>, vector<32x32xbf16>
    %cst_14 = arith.constant dense<0.000000e+00> : vector<64x32xf32>
    %13 = tpu.matmul %11, %12, %cst_14 {dimension_numbers = #tpu.dot_dimension_numbers<[1], [0], [0], [1], [0, 0, 1, 1], [], []>} : vector<64x32xbf16>, vector<32x32xbf16>, vector<64x32xf32> -> vector<64x32xf32>
    %14 = vector.shape_cast %13 : vector<64x32xf32> to vector<8x8x32xf32>
    %15 = vector.shape_cast %9 : vector<8x32xf32> to vector<8x1x32xf32>
    %16 = vector.broadcast %15 : vector<8x1x32xf32> to vector<8x8x32xf32>
    %17 = arith.addf %14, %16 : vector<8x8x32xf32>
    %18 = math.tanh %17 : vector<8x8x32xf32>
    %c0_15 = arith.constant 0 : index
    %c0_16 = arith.constant 0 : index
    %19 = vector.load %arg7[%c0_15, %c0_16] : memref<1x32xf32, #tpu.memory_space<vmem>>, vector<1x32xf32>
    %20 = vector.shape_cast %19 : vector<1x32xf32> to vector<1x1x32xf32>
    %21 = vector.broadcast %20 : vector<1x1x32xf32> to vector<8x8x32xf32>
    %22 = arith.mulf %18, %21 : vector<8x8x32xf32>
    %cst_17 = arith.constant dense<0.000000e+00> : vector<8x8xf32>
    %23 = vector.multi_reduction <add>, %22, %cst_17 [2] : vector<8x8x32xf32> to vector<8x8xf32>
    %cst_18 = arith.constant dense<0xFF800000> : vector<8xf32>
    %24 = vector.multi_reduction <maximumf>, %23, %cst_18 [1] : vector<8x8xf32> to vector<8xf32>
    %25 = vector.shape_cast %24 : vector<8xf32> to vector<8x1xf32>
    %26 = vector.broadcast %25 : vector<8x1xf32> to vector<8x8xf32>
    %27 = arith.subf %23, %26 : vector<8x8xf32>
    %28 = math.exp %27 : vector<8x8xf32>
    %cst_19 = arith.constant dense<0.000000e+00> : vector<8xf32>
    %29 = vector.multi_reduction <add>, %28, %cst_19 [1] : vector<8x8xf32> to vector<8xf32>
    %30 = vector.shape_cast %29 : vector<8xf32> to vector<8x1xf32>
    %31 = tpu.reciprocal %30 {approx = true} : vector<8x1xf32> -> vector<8x1xf32>
    %32 = vector.broadcast %31 : vector<8x1xf32> to vector<8x8xf32>
    %33 = arith.mulf %28, %32 : vector<8x8xf32>
    %34 = vector.shape_cast %33 : vector<8x8xf32> to vector<8x8x1xf32>
    %35 = vector.broadcast %34 : vector<8x8x1xf32> to vector<8x8x32xf32>
    %36 = arith.mulf %35, %1 : vector<8x8x32xf32>
    %cst_20 = arith.constant dense<0.000000e+00> : vector<8x32xf32>
    %37 = vector.multi_reduction <add>, %36, %cst_20 [1] : vector<8x8x32xf32> to vector<8x32xf32>
    %38 = tpu.concatenate %0, %37 in 1 : vector<8x32xf32>, vector<8x32xf32> -> vector<8x64xf32>
    %39 = arith.truncf %38 : vector<8x64xf32> to vector<8x64xbf16>
    %c0_21 = arith.constant 0 : index
    %c0_22 = arith.constant 0 : index
    %40 = vector.load %arg8[%c0_21, %c0_22] : memref<64x128xbf16, #tpu.memory_space<vmem>>, vector<64x128xbf16>
    %cst_23 = arith.constant dense<0.000000e+00> : vector<8x128xf32>
    %41 = tpu.matmul %39, %40, %cst_23 {dimension_numbers = #tpu.dot_dimension_numbers<[1], [0], [0], [1], [0, 0, 1, 1], [], []>} : vector<8x64xbf16>, vector<64x128xbf16>, vector<8x128xf32> -> vector<8x128xf32>
    %c0_24 = arith.constant 0 : index
    %c0_25 = arith.constant 0 : index
    %42 = vector.load %arg9[%c0_24, %c0_25] : memref<1x128xf32, #tpu.memory_space<vmem>>, vector<1x128xf32>
    %43 = vector.broadcast %42 : vector<1x128xf32> to vector<8x128xf32>
    %44 = arith.addf %41, %43 : vector<8x128xf32>
    %45 = vector.extract_strided_slice %44 {offsets = [0, 0], sizes = [8, 96], strides = [1, 1]} : vector<8x128xf32> to vector<8x96xf32>
    %46 = arith.negf %45 : vector<8x96xf32>
    %47 = math.exp %46 : vector<8x96xf32>
    %cst_26 = arith.constant 1.000000e+00 : f32
    %48 = vector.broadcast %cst_26 : f32 to vector<8x96xf32>
    %49 = arith.addf %48, %47 : vector<8x96xf32>
    %50 = arith.divf %48, %49 : vector<8x96xf32>
    %51 = vector.extract_strided_slice %50 {offsets = [0, 0], sizes = [8, 32], strides = [1, 1]} : vector<8x96xf32> to vector<8x32xf32>
    %52 = vector.extract_strided_slice %50 {offsets = [0, 32], sizes = [8, 32], strides = [1, 1]} : vector<8x96xf32> to vector<8x32xf32>
    %53 = vector.extract_strided_slice %50 {offsets = [0, 64], sizes = [8, 32], strides = [1, 1]} : vector<8x96xf32> to vector<8x32xf32>
    %54 = vector.extract_strided_slice %44 {offsets = [0, 96], sizes = [8, 32], strides = [1, 1]} : vector<8x128xf32> to vector<8x32xf32>
    %55 = math.tanh %54 : vector<8x32xf32>
    %56 = arith.mulf %52, %3 : vector<8x32xf32>
    %57 = arith.mulf %51, %55 : vector<8x32xf32>
    %58 = arith.addf %56, %57 : vector<8x32xf32>
    %59 = math.tanh %58 : vector<8x32xf32>
    %60 = arith.mulf %53, %59 : vector<8x32xf32>
    %61 = tpu.concatenate %60, %58 in 1 : vector<8x32xf32>, vector<8x32xf32> -> vector<8x64xf32>
    %c0_27 = arith.constant 0 : index
    %c0_28 = arith.constant 0 : index
    %62 = vector.load %arg10[%c0_27, %c0_28] : memref<8x64xf32, #tpu.memory_space<vmem>>, vector<8x64xf32>
    tpu.vector_store %arg10[%c0_27, %c0_28], %61 {strides = array<i32>} : memref<8x64xf32, #tpu.memory_space<vmem>>, vector<8x64xf32>,
    return
  }
}

</mosaic_0001>

<bundles_post_ra>
// kernel: tpu_custom_call.1
= control target key start
LH: loop header
LB: loop body
LE: loop exit
PB: predicated region body
PF: predicated region fallthrough
CT: control target
= control target key end

     0   :  { %15 = vsyncpa [#allocation3], 0  ;;  %s1582_s0 = inlined_call_operand.hbm [shape: f32[8,32], index: 0, kind: input, shape index: {}]   ;;  %s1583_s1 = inlined_call_operand.hbm [shape: f32[8,8,32], index: 1, kind: input, shape index: {}]   ;;  %s1584_s2 = inlined_call_operand.hbm [shape: f32[8,32], index: 2, kind: input, shape index: {}]   ;;  %s1585_s3 = inlined_call_operand.hbm [shape: f32[8,32], index: 3, kind: input, shape index: {}]   ;;  %s1586_s4 = inlined_call_operand.hbm [shape: bf16[32,32], index: 4, kind: input, shape index: {}]   ;;  %s1587_s5 = inlined_call_operand.vmem [shape: f32[1,32], index: 5, kind: input, shape index: {}]   ;;  %s1588_s6 = inlined_call_operand.vmem [shape: bf16[32,32], index: 6, kind: input, shape index: {}]   ;;  %s1589_s7 = inlined_call_operand.vmem [shape: f32[1,32], index: 7, kind: input, shape index: {}]   ;;  %s1590_s8 = inlined_call_operand.hbm [shape: bf16[64,128], index: 8, kind: input, shape index: {}]   ;;  %s1591_s9 = inlined_call_operand.vmem [shape: f32[1,128], index: 9, kind: input, shape index: {}]   ;;  %s1592_s10 = inlined_call_operand.hbm [shape: f32[8,64], index: 10, kind: output, shape index: {}]  }
   0x1   :  { %16 = vsyncpa [#allocation6], 0 }
   0x2   :  { %17 = vsyncpa [#allocation9], 0 }
   0x3   :  { %18 = vsyncpa [#allocation12], 0 }
   0x4   :  { %19 = vsyncpa [#allocation4], 0  ;;  %s1240_s13 = smov [#allocation5]   ;;  %s1076_s17 = scalar_lea.hbm %s1583_s1, 1024 }
   0x5   :  { %s35_s14 = sshll.u32 %s1240_s13, 4  ;;  %p1077_p0 = scmp.ne.s32.totalorder %s1583_s1, %s1076_s17  ;;  %s36_s14 = int_to_ptr.vmem [resolvable:$true] %s35_s14 }
   0x6   :  { %p1080_p1 = scmp.lt.u32.totalorder %s1076_s17, %s1583_s1 }
   0x8   :  { %p1082_p2 = pnand %p1080_p1, %p1077_p0 }
   0xa   :  { %1085 = shalt.err (!%p1082_p2)
}
   0xb   :  { %s1086_s22 = scalar_lea.vmem %s36_s14, 1024  ;;  %p1091_p4 = scmp.lt.s32.totalorder %s36_s14, %s36_s14 }
   0xc   :  { %p1087_p3 = scmp.ne.s32.totalorder %s36_s14, %s1086_s22  ;;  %p1092_p5 = scmp.lt.s32.totalorder %s1086_s22, %s1086_s22 }
   0xe   :  { %p1093_p6 = por %p1092_p5, %p1091_p4 }
  0x10   :  { %p1094_p7 = pnand %p1093_p6, %p1087_p3 }
  0x12   :  { %1097 = shalt.err (!%p1094_p7)
}
  0x13   :  { %s1241_s23 = smov 128   ;;  %s1242_s24 = smov 8  }
  0x14   :  { %41 = dma.hbm_to_vmem [thread:$0]  %s1583_s1, 1024, %s36_s14, [#allocation6], %s1241_s23, %s1241_s23, %s1242_s24  }
  0x15   :  { %s1243_s27 = smov [#allocation8]   ;;  %s1244_s29 = smov [#allocation2]  }
  0x16   :  { %s58_s28 = sshll.u32 %s1243_s27, 4  ;;  %s26_s30 = sshll.u32 %s1244_s29, 4  ;;  %s59_s28 = int_to_ptr.vmem [resolvable:$true] %s58_s28  ;;  %s27_s30 = int_to_ptr.vmem [resolvable:$true] %s26_s30 }
  0x17   :  { %s1098_s13 = scalar_lea.hbm %s1585_s3, 128 }
  0x18   :  { %p1099_p8 = scmp.ne.s32.totalorder %s1585_s3, %s1098_s13  ;;  %p1102_p9 = scmp.lt.u32.totalorder %s1098_s13, %s1585_s3 }
  0x1a   :  { %p1104_p10 = pnand %p1102_p9, %p1099_p8 }
  0x1c   :  { %1107 = shalt.err (!%p1104_p10)
}
  0x1d   :  { %s1108_s1 = scalar_lea.vmem %s59_s28, 128  ;;  %p1113_p12 = scmp.lt.s32.totalorder %s59_s28, %s59_s28 }
  0x1e   :  { %p1109_p11 = scmp.ne.s32.totalorder %s59_s28, %s1108_s1  ;;  %p1114_p13 = scmp.lt.s32.totalorder %s1108_s1, %s1108_s1 }
  0x20   :  { %p1115_p0 = por %p1114_p13, %p1113_p12 }
  0x22   :  { %p1116_p1 = pnand %p1115_p0, %p1109_p11 }
  0x24   :  { %1119 = shalt.err (!%p1116_p1)
}
  0x25   :  { %61 = dma.hbm_to_vmem [thread:$0]  %s1585_s3, 128, %s59_s28, [#allocation9]  }
  0x26   :  { %s1120_s22 = scalar_lea.hbm %s1582_s0, 128 }
  0x27   :  { %p1121_p2 = scmp.ne.s32.totalorder %s1582_s0, %s1120_s22  ;;  %p1124_p3 = scmp.lt.u32.totalorder %s1120_s22, %s1582_s0 }
  0x29   :  { %p1126_p4 = pnand %p1124_p3, %p1121_p2 }
  0x2b   :  { %1129 = shalt.err (!%p1126_p4)
}
  0x2c   :  { %s1130_s27 = scalar_lea.vmem %s27_s30, 128  ;;  %p1135_p6 = scmp.lt.s32.totalorder %s27_s30, %s27_s30 }
  0x2d   :  { %p1131_p5 = scmp.ne.s32.totalorder %s27_s30, %s1130_s27  ;;  %p1136_p7 = scmp.lt.s32.totalorder %s1130_s27, %s1130_s27 }
  0x2f   :  { %p1137_p8 = por %p1136_p7, %p1135_p6 }
  0x31   :  { %p1138_p9 = pnand %p1137_p8, %p1131_p5 }
  0x33   :  { %1141 = shalt.err (!%p1138_p9)
}
  0x34   :  { %29 = dma.hbm_to_vmem [thread:$0]  %s1582_s0, 128, %s27_s30, [#allocation3]  }
  0x35   :  { %s1245_s29 = smov [#allocation7]   ;;  %s1246_s12 = smov [#allocation10]  }
  0x36   :  { %s48_s11 = sshll.u32 %s1245_s29, 4  ;;  %s67_s13 = sshll.u32 %s1246_s12, 4  ;;  %s49_s11 = int_to_ptr.vmem [resolvable:$true] %s48_s11  ;;  %s68_s13 = int_to_ptr.vmem [resolvable:$true] %s67_s13 }
  0x37   :  { %s1142_s17 = scalar_lea.hbm %s1584_s2, 128 }
  0x38   :  { %p1143_p10 = scmp.ne.s32.totalorder %s1584_s2, %s1142_s17  ;;  %p1146_p11 = scmp.lt.u32.totalorder %s1142_s17, %s1584_s2 }
  0x3a   :  { %p1148_p12 = pnand %p1146_p11, %p1143_p10 }
  0x3c   :  { %1151 = shalt.err (!%p1148_p12)
}
  0x3d   :  { %s1152_s0 = scalar_lea.vmem %s49_s11, 128  ;;  %p1157_p0 = scmp.lt.s32.totalorder %s49_s11, %s49_s11 }
  0x3e   :  { %p1153_p13 = scmp.ne.s32.totalorder %s49_s11, %s1152_s0  ;;  %p1158_p1 = scmp.lt.s32.totalorder %s1152_s0, %s1152_s0 }
  0x40   :  { %p1159_p2 = por %p1158_p1, %p1157_p0 }
  0x42   :  { %p1160_p3 = pnand %p1159_p2, %p1153_p13 }
  0x44   :  { %1163 = shalt.err (!%p1160_p3)
}
  0x45   :  { %51 = dma.hbm_to_vmem [thread:$0]  %s1584_s2, 128, %s49_s11, [#allocation6]  }
  0x46   :  { %s1164_s23 = scalar_lea.hbm %s1586_s4, 256 }
  0x47   :  { %p1165_p4 = scmp.ne.s32.totalorder %s1586_s4, %s1164_s23  ;;  %p1168_p5 = scmp.lt.u32.totalorder %s1164_s23, %s1586_s4 }
  0x49   :  { %p1170_p6 = pnand %p1168_p5, %p1165_p4 }
  0x4b   :  { %1173 = shalt.err (!%p1170_p6)
}
  0x4c   :  { %s1174_s3 = scalar_lea.vmem %s68_s13, 256  ;;  %p1179_p8 = scmp.lt.s32.totalorder %s68_s13, %s68_s13 }
  0x4d   :  { %p1175_p7 = scmp.ne.s32.totalorder %s68_s13, %s1174_s3  ;;  %p1180_p9 = scmp.lt.s32.totalorder %s1174_s3, %s1174_s3 }
  0x4f   :  { %p1181_p10 = por %p1180_p9, %p1179_p8 }
  0x51   :  { %p1182_p11 = pnand %p1181_p10, %p1175_p7 }
  0x53   :  { %1185 = shalt.err (!%p1182_p11)
}
  0x54   :  { %s1247_s2 = smov 64   ;;  %s1248_s28 = smov 4  }
  0x55   :  { %73 = dma.hbm_to_vmem [thread:$0]  %s1586_s4, 256, %s68_s13, [#allocation9], %s1247_s2, %s1247_s2, %s1248_s28  }
  0x56   :  { %s1249_s12 = smov [#allocation11]   ;;  %s1186_s18 = scalar_lea.hbm %s1590_s8, 512 }
  0x57   :  { %s85_s15 = sshll.u32 %s1249_s12, 4  ;;  %p1187_p12 = scmp.ne.s32.totalorder %s1590_s8, %s1186_s18  ;;  %s86_s15 = int_to_ptr.vmem [resolvable:$true] %s85_s15 }
  0x58   :  { %p1190_p13 = scmp.lt.u32.totalorder %s1186_s18, %s1590_s8 }
  0x5a   :  { %p1192_p0 = pnand %p1190_p13, %p1187_p12 }
  0x5c   :  { %1195 = shalt.err (!%p1192_p0)
}
  0x5d   :  { %s1196_s30 = scalar_lea.vmem %s86_s15, 512  ;;  %p1201_p2 = scmp.lt.s32.totalorder %s86_s15, %s86_s15 }
  0x5e   :  { %p1197_p1 = scmp.ne.s32.totalorder %s86_s15, %s1196_s30  ;;  %p1202_p3 = scmp.lt.s32.totalorder %s1196_s30, %s1196_s30 }
  0x60   :  { %p1203_p4 = por %p1202_p3, %p1201_p2 }
  0x62   :  { %p1204_p5 = pnand %p1203_p4, %p1197_p1 }
  0x64   :  { %1207 = shalt.err (!%p1204_p5)
}
  0x65   :  { %91 = dma.hbm_to_vmem [thread:$0]  %s1590_s8, 512, %s86_s15, [#allocation12], %s1247_s2, %s1247_s2, %s1248_s28  }
  0x66   :  { %1230 = dma.done.wait [#allocation3], 128  }
  0x67   :  { %1231 = vsyncadd [#allocation3], 4294967168 }
  0x68   :  { %1232 = dma.done.wait [#allocation6], 1152  }
  0x69   :  { %1233 = vsyncadd [#allocation6], 4294966144 }
  0x6a   :  { %1234 = dma.done.wait [#allocation9], 384  }
  0x6b   :  { %1235 = vsyncadd [#allocation9], 4294966912 }
  0x6c   :  { %1236 = dma.done.wait [#allocation12], 512  }
  0x6d   :  { %1237 = vsyncadd [#allocation12], 4294966784  ;;  %v1250_v0 = vmov 0.0   ;;  %vm1251_vm0 = vmmov 0   ;;  %v1026_v1 = vld [vmem:[#allocation10] sm:$0xff]   ;;  %v1027_v2 = vld [vmem:[%s1588_s6] sm:$0xff]   ;;  %v294_v21 = vlaneseq }
  0x6e   :  { %976 = vmatprep.subr.bf16.mxu0 %v1250_v0  ;;  %980 = vmatprep.mubr.msk.bf16.mxu0 %vm1251_vm0, %v1250_v0  ;;  %v1028_v3 = vld [vmem:[#allocation10 + $0x8] sm:$0xff]   ;;  %v1029_v4 = vld [vmem:[%s1588_s6 + $0x8] sm:$0xff]   ;;  %v122_v5 = vld [vmem:[#allocation7] sm:$0xff]  ;;  %vm148_vm1 = vcmask 261120   ;;  %v1252_v19 = vmov 1966171168  }
  0x6f   :  { %977 = vmatpush3.bf16.msra.mxu0 %v1026_v1  ;;  %984 = vmatprep.subr.bf16.mxu1 %v1027_v2  ;;  %v1397_v6 = vld [vmem:[#allocation5] sm:$0xff]  ;;  %v1399_v7 = vld [vmem:[#allocation5 + $0x8] sm:$0xff]  ;;  %v124_v8 = vpack.c.bf16 %v122_v5, %v122_v5  ;;  %v1403_v10 = vld [vmem:[#allocation5 + $0x10] sm:$0xff]  ;;  %v292_v20 = vunpack.c.l.s4 %v1252_v19  ;;  %v1430_v23 = vshrl.u32 %v294_v21, 7  ;;  %vm476_vm2 = vcmask 1041409  }
  0x70   :  { %978 = vmatprep.subr.bf16.mxu0 %v1250_v0  ;;  %985 = vmatpush3.bf16.msra.mxu1 %v1027_v2  ;;  %v192_v9 = vpack.c.bf16 %v1399_v7, %v1397_v6  ;;  %v1405_v11 = vld [vmem:[#allocation5 + $0x18] sm:$0xff]  ;;  %v1407_v12 = vld [vmem:[#allocation5 + $0x20] sm:$0xff]  ;;  %v1409_v13 = vld [vmem:[#allocation5 + $0x28] sm:$0xff]  ;;  %vm478_vm3 = vcmask 1042434   ;;  %vm480_vm4 = vcmask 1043459   ;;  %vm482_vm5 = vcmask 1044484  }
  0x71   :  { %986 = vmatprep.subr.bf16.mxu1 %v1029_v4  ;;  %v193_v14 = vpack.c.bf16 %v1405_v11, %v1403_v10  ;;  %v194_v15 = vpack.c.bf16 %v1409_v13, %v1407_v12  ;;  %v1422_v16 = vld [vmem:[#allocation5 + $0x30] sm:$0xff]  ;;  %v1424_v17 = vld [vmem:[#allocation5 + $0x38] sm:$0xff]  ;;  %v293_v22 = vunpack.c.0.s8 %v292_v20  ;;  %v944_v24 = vld [vmem:[%s1587_s5] ss:$0 sm:$0xff]  ;;  %v1437_v34 = vsub.s32 0, %v1430_v23 }
  0x72   :  { %988 = vmatprep.mubr.msk.bf16.mxu1 %vm148_vm1, %v192_v9  ;;  %v195_v18 = vpack.c.bf16 %v1424_v17, %v1422_v16  ;;  %vm484_vm6 = vcmask 1045509   ;;  %vm486_vm7 = vcmask 1046534   ;;  %vm488_vm8 = vcmask 1047559  }
  0x73   :  { %979 = vmatpush3.bf16.msra.mxu0 %v1028_v3  ;;  %v296_v25 = vsub.s32 %v293_v22, %v1430_v23  ;;  %vm491_vm9 = vcmask 64512   ;;  %vm848_vm10 = vcmask 523264  }
  0x74   :  { %996 = vmatprep.subr.bf16.mxu0 %v1250_v0  ;;  %987 = vmatpush3.bf16.msra.mxu1 %v1029_v4 }
  0x76   :  { %981 = vmatmul.mubr.msk.bf16.vlgmr.msra.gmra.mrb[0].mxu0 %vm148_vm1, %v124_v8  ;;  %v954_v8 = vld [vmem:[%s1589_s7] ss:$0 sm:$0xff]  ;;  %s1254_s7 = smov 32  }
  0x77   :  { %1004 = vmatprep.mubr.msk.bf16.mxu0 %vm1251_vm0, %v1250_v0  ;;  %989 = vmatmul.mubr.msk.bf16.vlgmr.msra.gmra.mrb[0].mxu1 %vm148_vm1, %v193_v14 }
  0x78   :  { %992 = vmatprep.mubr.msk.bf16.mxu1 %vm148_vm1, %v194_v15 }
  0x7f   :  { %993 = vmatmul.mubr.msk.bf16.gmra.mrb[4].mxu1 %vm148_vm1, %v195_v18 }
 0x149   :  { %v186_v26 = vpop.f32.mrb[0].mxu0 }
 0x14a   :  { %v187_v27 = vadd.f32 %v944_v24, %v186_v26  ;;  %v982_v28 = vpop.f32.mrb[1].mxu0  ;;  %v990_v30 = vpop.f32.mrb[0].mxu1 }
 0x14b   :  { %v189_v29 = vpop.f32.mrb[2].mxu0  ;;  %v258_v35 = vpop.f32.mrb[1].mxu1 }
 0x14c   :  { %v290_v31 = vcombine.high %v187_v27, %v187_v27  ;;  %v297_v32 = vrot.slane %v187_v27, %v296_v25  ;;  %v983_v33 = vpop.f32.mrb[3].mxu0  ;;  %v991_v36 = vpop.f32.mrb[2].mxu1 }
 0x14d   :  { %v261_v40 = vpop.f32.mrb[3].mxu1 }
 0x14e   :  { %v304_v37 = vrot.slane %v290_v31, %v296_v25  ;;  %v305_v38 = vcombine.high %v297_v32, %v297_v32  ;;  %v313_v39 = vrot.slane %v297_v32, %v296_v25 }
 0x150   :  { %v306_v41 = vcombine.high %v304_v37, %v304_v37  ;;  %v335_v42 = vcombine.high %v313_v39, %v313_v39  ;;  %v342_v43 = vrot.slane %v313_v39, %v1437_v34  ;;  %v327_v44 = vrot.slane %v305_v38, %v296_v25 }
 0x151   :  { %v320_v45 = vrot.slane %v304_v37, %v296_v25 }
 0x152   :  { %v350_v46 = vrot.slane %v335_v42, %v1437_v34  ;;  %v379_v47 = vadd.f32 %v342_v43, %v258_v35  ;;  %v337_v48 = vcombine.high %v327_v44, %v327_v44  ;;  %v346_v49 = vrot.slane %v327_v44, %v1437_v34  ;;  %v994_v50 = vpop.f32.mrb[4].mxu1 }
 0x153   :  { %v336_v51 = vcombine.high %v320_v45, %v320_v45  ;;  %v358_v52 = vrot.slane %v320_v45, %v1437_v34  ;;  %v334_v53 = vrot.slane %v306_v41, %v296_v25  ;;  %v274_v57 = vpop.f32.mrb[5].mxu1  ;;  %v443_v42 = vand.u32 127, %v294_v21 }
 0x154   :  { %v381_v54 = vadd.f32 %v990_v30, %v350_v46  ;;  %1034 = vtanh.f32 %v379_v47  ;;  %v354_v55 = vrot.slane %v337_v48, %v1437_v34  ;;  %v380_v56 = vadd.f32 %v346_v49, %v261_v40  ;;  %v995_v60 = vpop.f32.mrb[6].mxu1 }
 0x155   :  { %v366_v58 = vrot.slane %v336_v51, %v1437_v34  ;;  %v383_v59 = vadd.f32 %v358_v52, %v274_v57  ;;  %v338_v61 = vcombine.high %v334_v53, %v334_v53  ;;  %v362_v62 = vrot.slane %v334_v53, %v1437_v34  ;;  %v277_v1 = vpop.f32.mrb[7].mxu1 }
 0x156   :  { %1036 = vtanh.f32 %v381_v54  ;;  %v382_v63 = vadd.f32 %v991_v36, %v354_v55  ;;  %v1460_v44 = vsub.s32 %v443_v42, %v1430_v23 }
 0x157   :  { %1038 = vtanh.f32 %v380_v56  ;;  %v385_v2 = vadd.f32 %v994_v50, %v366_v58  ;;  %v370_v3 = vrot.slane %v338_v61, %v1437_v34  ;;  %v384_v4 = vadd.f32 %v362_v62, %v277_v1 }
 0x158   :  { %1040 = vtanh.f32 %v382_v63 }
 0x159   :  { %v386_v5 = vadd.f32 %v995_v60, %v370_v3  ;;  %1042 = vtanh.f32 %v383_v59 }
 0x15a   :  { %1044 = vtanh.f32 %v385_v2 }
 0x15b   :  { %1046 = vtanh.f32 %v384_v4  ;;  %v1253_v4 = vmov 0  }
 0x15c   :  { %1048 = vtanh.f32 %v386_v5  ;;  %1025 = vset.pattern.permute.xlu0 %v1253_v4  ;;  %1024 = vset.pattern.permute.xlu1 %v1253_v4  ;;  %v502_v5 = vsub.s32 1, %v1430_v23 }
 0x15e   :  { %v1035_v9 = vpop.eup %1034 }
 0x15f   :  { %v402_v14 = vmul.f32 %v1035_v9, %v954_v8  ;;  %v510_v9 = vsub.s32 3, %v1430_v23 }
 0x160   :  { %v1037_v15 = vpop.eup %1036 }
 0x161   :  { %v1039_v18 = vpop.eup %1038  ;;  %v410_v19 = vsel %vm148_vm1, %v402_v14, 0.0  ;;  %v404_v20 = vmul.f32 %v1037_v15, %v954_v8 }
 0x162   :  { %v1041_v22 = vpop.eup %1040  ;;  %411 = vadd.xlane.f32.xlu0 %v410_v19  ;;  %v403_v24 = vmul.f32 %v1039_v18, %v954_v8 }
 0x163   :  { %v416_v25 = vsel %vm148_vm1, %v404_v20, 0.0  ;;  %v405_v26 = vmul.f32 %v1041_v22, %v954_v8  ;;  %v1043_v27 = vpop.eup %1042  ;;  %v514_v20 = vsub.s32 4, %v1430_v23 }
 0x164   :  { %417 = vadd.xlane.f32.xlu1 %v416_v25  ;;  %v1045_v28 = vpop.eup %1044  ;;  %v413_v29 = vsel %vm148_vm1, %v403_v24, 0.0  ;;  %v406_v30 = vmul.f32 %v1043_v27, %v954_v8 }
 0x165   :  { %v1047_v31 = vpop.eup %1046  ;;  %v419_v32 = vsel %vm148_vm1, %v405_v26, 0.0  ;;  %v408_v37 = vmul.f32 %v1045_v28, %v954_v8 }
 0x166   :  { %414 = vadd.xlane.f32.xlu0 %v413_v29  ;;  %v407_v33 = vmul.f32 %v1047_v31, %v954_v8  ;;  %v1049_v35 = vpop.eup %1048  ;;  %v422_v36 = vsel %vm148_vm1, %v406_v30, 0.0  ;;  %v518_v29 = vsub.s32 5, %v1430_v23 }
 0x167   :  { %v409_v39 = vmul.f32 %v1049_v35, %v954_v8  ;;  %v428_v40 = vsel %vm148_vm1, %v408_v37, 0.0  ;;  %v506_v8 = vsub.s32 2, %v1430_v23 }
 0x168   :  { %420 = vadd.xlane.f32.xlu1 %v419_v32  ;;  %v425_v38 = vsel %vm148_vm1, %v407_v33, 0.0  ;;  %v522_v33 = vsub.s32 6, %v1430_v23 }
 0x169   :  { %v431_v41 = vsel %vm148_vm1, %v409_v39, 0.0 }
 0x16a   :  { %423 = vadd.xlane.f32.xlu0 %v422_v36 }
 0x16c   :  { %426 = vadd.xlane.f32.xlu1 %v425_v38  ;;  %v526_v38 = vsub.s32 7, %v1430_v23 }
 0x16e   :  { %429 = vadd.xlane.f32.xlu0 %v428_v40 }
 0x170   :  { %432 = vadd.xlane.f32.xlu1 %v431_v41 }
 0x1ef   :  { %v412_v43 = vpop.xlane.xlu0 %411 }
 0x1f0   :  { %v447_v47 = vrot.slane %v412_v43, %v1460_v44 }
 0x1f1   :  { %v418_v45 = vpop.xlane.xlu1 %417 }
 0x1f2   :  { %v455_v49 = vrot.slane %v418_v45, %v1460_v44 }
 0x1f3   :  { %v415_v46 = vpop.xlane.xlu0 %414 }
 0x1f4   :  { %v451_v48 = vrot.slane %v415_v46, %v1460_v44 }
 0x1f5   :  { %v421_v50 = vpop.xlane.xlu1 %420 }
 0x1f6   :  { %v477_v51 = vsel %vm476_vm2, %v451_v48, %v447_v47  ;;  %v459_v21 = vrot.slane %v421_v50, %v1460_v44 }
 0x1f7   :  { %v479_v52 = vsel %vm478_vm3, %v455_v49, %v477_v51  ;;  %v424_v53 = vpop.xlane.xlu0 %423 }
 0x1f8   :  { %v481_v54 = vsel %vm480_vm4, %v459_v21, %v479_v52  ;;  %v463_v55 = vrot.slane %v424_v53, %v1460_v44 }
 0x1f9   :  { %v427_v56 = vpop.xlane.xlu1 %426 }
 0x1fa   :  { %v483_v57 = vsel %vm482_vm5, %v463_v55, %v481_v54  ;;  %v467_v58 = vrot.slane %v427_v56, %v1460_v44 }
 0x1fb   :  { %v430_v59 = vpop.xlane.xlu0 %429 }
 0x1fc   :  { %v471_v60 = vrot.slane %v430_v59, %v1460_v44  ;;  %v485_v61 = vsel %vm484_vm6, %v467_v58, %v483_v57 }
 0x1fd   :  { %v433_v62 = vpop.xlane.xlu1 %432 }
 0x1fe   :  { %v475_v63 = vrot.slane %v433_v62, %v1460_v44  ;;  %v487_v1 = vsel %vm486_vm7, %v471_v60, %v485_v61 }
 0x200   :  { %v489_v2 = vsel %vm488_vm8, %v475_v63, %v487_v1 }
 0x201   :  { %v492_v3 = vsel %vm491_vm9, %v489_v2, -inf }
 0x202   :  { %493 = vmax.xlane.f32.xlu0 %v492_v3 }
 0x28f   :  { %v494_v14 = vpop.xlane.xlu0 %493 }
 0x290   :  { %v499_v15 = vrot.slane %v494_v14, %v1437_v34  ;;  %v503_v18 = vrot.slane %v494_v14, %v502_v5  ;;  %v507_v19 = vrot.slane %v494_v14, %v506_v8  ;;  %v511_v22 = vrot.slane %v494_v14, %v510_v9 }
 0x291   :  { %v515_v30 = vrot.slane %v494_v14, %v514_v20  ;;  %v519_v35 = vrot.slane %v494_v14, %v518_v29  ;;  %v523_v39 = vrot.slane %v494_v14, %v522_v33 }
 0x292   :  { %v536_v24 = vsub.f32 %v412_v43, %v499_v15  ;;  %v537_v25 = vsub.f32 %v415_v46, %v503_v18  ;;  %v538_v26 = vsub.f32 %v418_v45, %v507_v19  ;;  %v539_v31 = vsub.f32 %v421_v50, %v511_v22 }
 0x293   :  { %v540_v36 = vsub.f32 %v424_v53, %v515_v30  ;;  %v541_v40 = vsub.f32 %v427_v56, %v519_v35  ;;  %v527_v45 = vrot.slane %v494_v14, %v526_v38  ;;  %v542_v46 = vsub.f32 %v430_v59, %v523_v39 }
 0x294   :  { %v544_v27 = vmul.f32 1.442695, %v536_v24  ;;  %v546_v28 = vmul.f32 1.442695, %v537_v25  ;;  %v548_v32 = vmul.f32 1.442695, %v538_v26 }
 0x295   :  { %v550_v37 = vmul.f32 1.442695, %v539_v31  ;;  %v552_v41 = vmul.f32 1.442695, %v540_v36  ;;  %v554_v47 = vmul.f32 1.442695, %v541_v40  ;;  %v543_v49 = vsub.f32 %v433_v62, %v527_v45 }
 0x296   :  { %1050 = vpow2.f32 %v544_v27  ;;  %v556_v50 = vmul.f32 1.442695, %v542_v46 }
 0x297   :  { %1052 = vpow2.f32 %v546_v28  ;;  %v558_v21 = vmul.f32 1.442695, %v543_v49  ;;  %v1030_v49 = vld [vmem:[#allocation11] sm:$0xff]  }
 0x298   :  { %1054 = vpow2.f32 %v548_v32  ;;  %997 = vmatpush3.bf16.msra.mxu0 %v1030_v49 }
 0x299   :  { %1056 = vpow2.f32 %v550_v37  ;;  %998 = vmatprep.subr.bf16.mxu0 %v1250_v0 }
 0x29a   :  { %1058 = vpow2.f32 %v552_v41 }
 0x29b   :  { %1060 = vpow2.f32 %v554_v47 }
 0x29c   :  { %1062 = vpow2.f32 %v556_v50 }
 0x29d   :  { %1064 = vpow2.f32 %v558_v21 }
 0x2a0   :  { %v1051_v42 = vpop.eup %1050 }
 0x2a1   :  { %v1053_v43 = vpop.eup %1052  ;;  %569 = vperm.xlu1 %1024, %v1051_v42  }
 0x2a2   :  { %572 = vperm.xlu0 %1025, %v1053_v43   ;;  %v1055_v48 = vpop.eup %1054 }
 0x2a3   :  { %v1057_v51 = vpop.eup %1056 }
 0x2a4   :  { %v1059_v52 = vpop.eup %1058 }
 0x2a5   :  { %575 = vperm.xlu1 %1024, %v1055_v48   ;;  %v1061_v53 = vpop.eup %1060 }
 0x2a6   :  { %v1063_v54 = vpop.eup %1062 }
 0x2a7   :  { %v1065_v55 = vpop.eup %1064 }
 0x2a9   :  { %578 = vperm.xlu1 %1024, %v1057_v51  }
 0x2ad   :  { %581 = vperm.xlu1 %1024, %v1059_v52  }
 0x2b1   :  { %584 = vperm.xlu1 %1024, %v1061_v53  }
 0x2b5   :  { %587 = vperm.xlu1 %1024, %v1063_v54  }
 0x2b9   :  { %590 = vperm.xlu1 %1024, %v1065_v55  }
 0x320   :  { %v570_v56 = vpop.permute.xlu1 %569 }
 0x321   :  { %v573_v60 = vpop.permute.xlu0 %572  ;;  %v595_v63 = vrot.slane %v570_v56, %v1460_v44 }
 0x322   :  { %v599_v62 = vrot.slane %v573_v60, %v1460_v44 }
 0x324   :  { %v576_v57 = vpop.permute.xlu1 %575  ;;  %v624_v14 = vsel %vm476_vm2, %v599_v62, %v595_v63 }
 0x325   :  { %v603_v1 = vrot.slane %v576_v57, %v1460_v44 }
 0x327   :  { %v625_v18 = vsel %vm478_vm3, %v603_v1, %v624_v14 }
 0x328   :  { %v579_v58 = vpop.permute.xlu1 %578 }
 0x329   :  { %v607_v2 = vrot.slane %v579_v58, %v1460_v44 }
 0x32b   :  { %v626_v22 = vsel %vm480_vm4, %v607_v2, %v625_v18 }
 0x32c   :  { %v582_v59 = vpop.permute.xlu1 %581 }
 0x32d   :  { %v611_v3 = vrot.slane %v582_v59, %v1460_v44 }
 0x32f   :  { %v627_v24 = vsel %vm482_vm5, %v611_v3, %v626_v22 }
 0x330   :  { %v585_v61 = vpop.permute.xlu1 %584 }
 0x331   :  { %v615_v15 = vrot.slane %v585_v61, %v1460_v44 }
 0x333   :  { %v628_v26 = vsel %vm484_vm6, %v615_v15, %v627_v24 }
 0x334   :  { %v588_v4 = vpop.permute.xlu1 %587 }
 0x335   :  { %v619_v19 = vrot.slane %v588_v4, %v1460_v44 }
 0x337   :  { %v629_v28 = vsel %vm486_vm7, %v619_v19, %v628_v26 }
 0x338   :  { %v591_v25 = vpop.permute.xlu1 %590 }
 0x339   :  { %v623_v27 = vrot.slane %v591_v25, %v1460_v44 }
 0x33b   :  { %v630_v30 = vsel %vm488_vm8, %v623_v27, %v629_v28 }
 0x33c   :  { %v632_v31 = vsel %vm491_vm9, %v630_v30, 0.0 }
 0x33d   :  { %633 = vadd.xlane.f32.xlu1 %v632_v31 }
 0x3ca   :  { %v634_v32 = vpop.xlane.xlu1 %633 }
 0x3cb   :  { %1066 = vrcp.f32 %v634_v32 }
 0x3d5   :  { %v1067_v35 = vpop.eup %1066 }
 0x3d6   :  { %v640_v36 = vrot.slane %v1067_v35, %v1437_v34  ;;  %v644_v39 = vrot.slane %v1067_v35, %v502_v5  ;;  %v648_v44 = vrot.slane %v1067_v35, %v506_v8  ;;  %v652_v45 = vrot.slane %v1067_v35, %v510_v9 }
 0x3d7   :  { %v656_v47 = vrot.slane %v1067_v35, %v514_v20  ;;  %v660_v5 = vrot.slane %v1067_v35, %v518_v29  ;;  %v664_v8 = vrot.slane %v1067_v35, %v522_v33  ;;  %v668_v9 = vrot.slane %v1067_v35, %v526_v38  ;;  %v1031_v20 = vld [vmem:[#allocation11 + $0x8] sm:$0xff]   ;;  %v1032_v29 = vld [vmem:[#allocation11 + $0x10] sm:$0xff]  }
 0x3d8   :  { %v677_v37 = vmul.f32 %v1051_v42, %v640_v36  ;;  %v678_v40 = vmul.f32 %v1053_v43, %v644_v39  ;;  %v679_v41 = vmul.f32 %v1055_v48, %v648_v44  ;;  %v680_v46 = vmul.f32 %v1057_v51, %v652_v45  ;;  %999 = vmatpush3.bf16.msra.mxu0 %v1031_v20 }
 0x3d9   :  { %v681_v34 = vmul.f32 %v1059_v52, %v656_v47  ;;  %v682_v42 = vmul.f32 %v1061_v53, %v660_v5  ;;  %v683_v43 = vmul.f32 %v1063_v54, %v664_v8  ;;  %v684_v48 = vmul.f32 %v1065_v55, %v668_v9  ;;  %1000 = vmatprep.subr.bf16.mxu0 %v1250_v0 }
 0x3da   :  { %687 = vperm.xlu0 %1025, %v677_v37  }
 0x3dc   :  { %1001 = vmatpush3.bf16.msra.mxu0 %v1032_v29 }
 0x3dd   :  { %1002 = vmatprep.subr.bf16.mxu0 %v1250_v0 }
 0x3de   :  { %692 = vperm.xlu0 %1025, %v678_v40  }
 0x3e2   :  { %697 = vperm.xlu0 %1025, %v679_v41  }
 0x3e6   :  { %702 = vperm.xlu0 %1025, %v680_v46  }
 0x3ea   :  { %707 = vperm.xlu0 %1025, %v681_v34  }
 0x3ee   :  { %712 = vperm.xlu0 %1025, %v682_v42  }
 0x3f2   :  { %717 = vperm.xlu0 %1025, %v683_v43   ;;  %v1033_v43 = vld [vmem:[#allocation11 + $0x18] sm:$0xff]  }
 0x3f3   :  { %1003 = vmatpush3.bf16.msra.mxu0 %v1033_v43 }
 0x3f6   :  { %722 = vperm.xlu0 %1025, %v684_v48  }
 0x459   :  { %v688_v33 = vpop.permute.xlu0 %687 }
 0x45a   :  { %v725_v51 = vmul.f32 %v688_v33, %v1397_v6 }
 0x45c   :  { %v733_v55 = vsel %vm148_vm1, %v725_v51, 0.0 }
 0x45d   :  { %v693_v50 = vpop.permute.xlu0 %692  ;;  %v734_v59 = vrot.slane %v733_v55, 4 }
 0x45e   :  { %v726_v23 = vmul.f32 %v693_v50, %v1399_v7 }
 0x45f   :  { %v735_v63 = vadd.f32 %v734_v59, %v733_v55 }
 0x460   :  { %v740_v52 = vsel %vm148_vm1, %v726_v23, 0.0 }
 0x461   :  { %v698_v38 = vpop.permute.xlu0 %697  ;;  %v741_v57 = vrot.slane %v740_v52, 4  ;;  %v736_v19 = vrot.slane %v735_v63, 2 }
 0x462   :  { %v727_v21 = vmul.f32 %v698_v38, %v1403_v10 }
 0x463   :  { %v742_v61 = vadd.f32 %v741_v57, %v740_v52  ;;  %v737_v32 = vadd.f32 %v736_v19, %v735_v63 }
 0x464   :  { %v747_v53 = vsel %vm148_vm1, %v727_v21, 0.0 }
 0x465   :  { %v703_v54 = vpop.permute.xlu0 %702  ;;  %v748_v0 = vrot.slane %v747_v53, 4 }
 0x466   :  { %v728_v56 = vmul.f32 %v703_v54, %v1405_v11  ;;  %v743_v11 = vrot.slane %v742_v61, 2 }
 0x467   :  { %v749_v10 = vadd.f32 %v748_v0, %v747_v53 }
 0x468   :  { %v754_v58 = vsel %vm148_vm1, %v728_v56, 0.0  ;;  %v744_v27 = vadd.f32 %v743_v11, %v742_v61 }
 0x469   :  { %v755_v7 = vrot.slane %v754_v58, 4  ;;  %v708_v60 = vpop.permute.xlu0 %707  ;;  %v750_v15 = vrot.slane %v749_v10, 2 }
 0x46a   :  { %v729_v6 = vmul.f32 %v708_v60, %v1407_v12  ;;  %v745_v44 = vrot.slane %v744_v27, 1  ;;  %v113_v60 = vld [vmem:[#allocation2] sm:$0xff] }
 0x46b   :  { %v756_v1 = vadd.f32 %v755_v7, %v754_v58  ;;  %v751_v30 = vadd.f32 %v750_v15, %v749_v10 }
 0x46c   :  { %v761_v62 = vsel %vm148_vm1, %v729_v6, 0.0  ;;  %v746_v9 = vadd.f32 %v745_v44, %v744_v27 }
 0x46d   :  { %v762_v2 = vrot.slane %v761_v62, 4  ;;  %v713_v3 = vpop.permute.xlu0 %712  ;;  %v757_v22 = vrot.slane %v756_v1, 2  ;;  %v752_v46 = vrot.slane %v751_v30, 1 }
 0x46e   :  { %v730_v4 = vmul.f32 %v713_v3, %v1409_v13 }
 0x46f   :  { %v763_v14 = vadd.f32 %v762_v2, %v761_v62  ;;  %v758_v35 = vadd.f32 %v757_v22, %v756_v1  ;;  %v753_v29 = vadd.f32 %v752_v46, %v751_v30  ;;  %v955_v62 = vld [vmem:[%s1591_s9] ss:$0 sm:$0xff]  ;;  %s1255_s9 = smov [#allocation13]  }
 0x470   :  { %v768_v18 = vsel %vm148_vm1, %v730_v4, 0.0  ;;  %s932_s27 = sshll.u32 %s1255_s9, 4  ;;  %s933_s27 = int_to_ptr.vmem [resolvable:$true] %s932_s27 }
 0x471   :  { %v769_v24 = vrot.slane %v768_v18, 4  ;;  %v718_v25 = vpop.permute.xlu0 %717  ;;  %v764_v12 = vrot.slane %v763_v14, 2  ;;  %v759_v34 = vrot.slane %v758_v35, 1  ;;  %s1208_s3 = scalar_lea.vmem %s933_s27, 128  ;;  %p1213_p7 = scmp.lt.s32.totalorder %s933_s27, %s933_s27 }
 0x472   :  { %v731_v26 = vmul.f32 %v718_v25, %v1422_v16  ;;  %v738_v16 = vrot.slane %v737_v32, 1  ;;  %p1209_p6 = scmp.ne.s32.totalorder %s933_s27, %s1208_s3  ;;  %p1214_p8 = scmp.lt.s32.totalorder %s1208_s3, %s1208_s3 }
 0x473   :  { %v770_v28 = vadd.f32 %v769_v24, %v768_v18  ;;  %v765_v39 = vadd.f32 %v764_v12, %v763_v14  ;;  %v123_v14 = vld [vmem:[#allocation8] sm:$0xff] }
 0x474   :  { %v775_v31 = vsel %vm148_vm1, %v731_v26, 0.0  ;;  %v739_v33 = vadd.f32 %v738_v16, %v737_v32  ;;  %p1215_p9 = por %p1214_p8, %p1213_p7 }
 0x475   :  { %v771_v13 = vrot.slane %v770_v28, 2  ;;  %v776_v36 = vrot.slane %v775_v31, 4  ;;  %v723_v37 = vpop.permute.xlu0 %722  ;;  %v766_v8 = vrot.slane %v765_v39, 1 }
 0x476   :  { %v732_v40 = vmul.f32 %v723_v37, %v1424_v17  ;;  %v760_v17 = vadd.f32 %v759_v34, %v758_v35  ;;  %v797_v51 = vsel %vm476_vm2, %v746_v9, %v739_v33  ;;  %p1216_p10 = pnand %p1215_p9, %p1209_p6 }
 0x477   :  { %v772_v41 = vadd.f32 %v771_v13, %v770_v28  ;;  %v777_v45 = vadd.f32 %v776_v36, %v775_v31  ;;  %v767_v38 = vadd.f32 %v766_v8, %v765_v39  ;;  %v798_v53 = vsel %vm478_vm3, %v753_v29, %v797_v51 }
 0x478   :  { %v782_v47 = vsel %vm148_vm1, %v732_v40, 0.0  ;;  %v799_v56 = vsel %vm480_vm4, %v760_v17, %v798_v53 }
 0x479   :  { %v778_v5 = vrot.slane %v777_v45, 2  ;;  %v783_v42 = vrot.slane %v782_v47, 4  ;;  %v773_v48 = vrot.slane %v772_v41, 1  ;;  %v800_v57 = vsel %vm482_vm5, %v767_v38, %v799_v56 }
 0x47b   :  { %v779_v49 = vadd.f32 %v778_v5, %v777_v45  ;;  %v784_v20 = vadd.f32 %v783_v42, %v782_v47  ;;  %v774_v21 = vadd.f32 %v773_v48, %v772_v41 }
 0x47d   :  { %v780_v50 = vrot.slane %v779_v49, 1  ;;  %v785_v23 = vrot.slane %v784_v20, 2  ;;  %v801_v58 = vsel %vm484_vm6, %v774_v21, %v800_v57 }
 0x47f   :  { %v786_v52 = vadd.f32 %v785_v23, %v784_v20  ;;  %v781_v54 = vadd.f32 %v780_v50, %v779_v49 }
 0x481   :  { %v787_v55 = vrot.slane %v786_v52, 1  ;;  %v802_v59 = vsel %vm486_vm7, %v781_v54, %v801_v58 }
 0x483   :  { %v788_v0 = vadd.f32 %v787_v55, %v786_v52 }
 0x485   :  { %v803_v7 = vsel %vm488_vm8, %v788_v0, %v802_v59 }
 0x486   :  { %804 = vrot.lane.b32.xlu1 %v803_v7, %s1254_s7 }
 0x4f8   :  { %v805_v6 = vpop.permute.xlu1 %804 }
 0x4f9   :  { %v807_v61 = vsel %vm148_vm1, %v113_v60, %v805_v6 }
 0x4fa   :  { %v808_v10 = vpack.c.bf16 %v807_v61, %v807_v61 }
 0x4fc   :  { %1005 = vmatmul.mubr.msk.bf16.vlgmr.msra.gmra.mrb[4].mxu0 %vm848_vm10, %v808_v10 }
 0x5cf   :  { %v886_v63 = vpop.f32.mrb[4].mxu0 }
 0x5d0   :  { %v887_v1 = vadd.f32 %v955_v62, %v886_v63  ;;  %v1006_v2 = vpop.f32.mrb[5].mxu0 }
 0x5d1   :  { %v889_v3 = vpop.f32.mrb[6].mxu0 }
 0x5d2   :  { %1068 = vtanh.f32 %v887_v1  ;;  %v1007_v4 = vpop.f32.mrb[7].mxu0  ;;  %v961_v15 = vmul.f32 -1.442695, %v887_v1 }
 0x5d4   :  { %1070 = vpow2.f32 %v961_v15 }
 0x5dc   :  { %v1069_v11 = vpop.eup %1068 }
 0x5dd   :  { %905 = vrot.lane.b32.xlu0 %v1069_v11, %s1254_s7 }
 0x5de   :  { %v1071_v18 = vpop.eup %1070 }
 0x5df   :  { %v895_v19 = vadd.f32 1.0, %v1071_v18 }
 0x5e1   :  { %900 = vrot.lane.b32.xlu0 %v123_v14, %s1254_s7  ;;  %1072 = vrcp.f32 %v895_v19 }
 0x5eb   :  { %v1073_v22 = vpop.eup %1072 }
 0x64f   :  { %v906_v24 = vpop.permute.xlu0 %905 }
 0x650   :  { %v908_v25 = vmul.f32 %v1073_v22, %v906_v24 }
 0x652   :  { %910 = vrot.lane.b32.xlu0 %v908_v25, %s1254_s7 }
 0x653   :  { %v901_v12 = vpop.permute.xlu0 %900 }
 0x654   :  { %v903_v26 = vmul.f32 %v1073_v22, %v901_v12 }
 0x6c4   :  { %v911_v27 = vpop.permute.xlu0 %910 }
 0x6c5   :  { %v913_v28 = vadd.f32 %v911_v27, %v903_v26 }
 0x6c7   :  { %1074 = vtanh.f32 %v913_v28 }
 0x6d1   :  { %v1075_v30 = vpop.eup %1074 }
 0x6d2   :  { %916 = vrot.lane.b32.xlu0 %v1075_v30, %s1254_s7 }
 0x744   :  { %v917_v31 = vpop.permute.xlu0 %916 }
 0x745   :  { %v919_v32 = vmul.f32 %v1073_v22, %v917_v31 }
 0x747   :  { %921 = vrot.lane.b32.xlu1 %v919_v32, %s1247_s2 }
 0x7b9   :  { %v922_v35 = vpop.permute.xlu1 %921 }
 0x7ba   :  { %v924_v13 = vsel %vm148_vm1, %v922_v35, %v913_v28 }
 0x7bb   :  { %925 = vst.msk [vmem:[#allocation13] sm:$0xff] %vm848_vm10, %v924_v13 }
 0x7bc   :  { %1219 = shalt.err (!%p1216_p10)
}
 0x7bd   :  { %s1220_s11 = scalar_lea.hbm %s1592_s10, 128 }
 0x7be   :  { %p1221_p11 = scmp.ne.s32.totalorder %s1592_s10, %s1220_s11  ;;  %p1224_p12 = scmp.lt.u32.totalorder %s1220_s11, %s1592_s10 }
 0x7c0   :  { %p1226_p13 = pnand %p1224_p12, %p1221_p11 }
 0x7c2   :  { %1229 = shalt.err (!%p1226_p13)
}
 0x7c3   :  { %935 = dma.vmem_to_hbm [thread:$0]  %s933_s27, 128, %s1592_s10, [#allocation4]  }
 0x7c4   :  { %1238 = dma.done.wait [#allocation4], 128  }
 0x7c5   :  { %1239 = vsyncadd [#allocation4], 4294967168 }
 0x7c6   :  { %939 = vsyncpa [#allocation3], 1 }
 0x7c7   :  { %940 = vsyncpa [#allocation6], 1 }
 0x7c8   :  { %941 = vsyncpa [#allocation9], 1 }
 0x7c9   :  { %942 = vsyncpa [#allocation12], 1 }
 0x7ca   :  { %943 = vsyncpa [#allocation4], 1 }

</bundles_post_ra>
